<compile_context>
chip_gen: v5e
topology: v5e:2x2
jax: 0.10.0
libtpu: 0.0.40
codegen_flags: <defaults>
</compile_context>

<pallas_src>
import jax
import jax.numpy as jnp
from jax.experimental import pallas as pl


# --------------------------------------------------------------------------
# Pallas kernel
# --------------------------------------------------------------------------
def _full_block(shape):
    """BlockSpec covering the whole array (kernel has no grid)."""
    zeros = (0,) * len(shape)
    return pl.BlockSpec(shape, lambda zeros=zeros: zeros)


def _make_fused_encode_kernel(n_layers, n_modes, relus, zp, compute_dtype):
    """Build the fused encode kernel.

    Ref order:
      x_ref        (N, F0)           compute dtype (bf16)
      adj_ref      (M, N, N)         compute dtype
      [w_ref, b_ref] * n_layers      w: (M, Fin, Fout) compute dtype, already
                                     pre-scaled by 1/M; b: (1, Fout) f32
      w_head_ref   (M, Flast, 2*zp)  compute dtype ([mean | log_std] concat,
                                     zero-padded to 128 lanes each, 1/M)
      b_head_ref   (1, 2*zp)         f32
      eps_ref      (N, zp)           f32
      o_ref        (N, zp)           f32   lane-dense z output
    """

    def kernel(x_ref, adj_ref, *rest):
        layer_refs = rest[:2 * n_layers]
        w_head_ref, b_head_ref, eps_ref, o_ref = rest[2 * n_layers:]
        cdt = compute_dtype

        adj = [adj_ref[m] for m in range(n_modes)]      # (N, N) each
        x = x_ref[...]                                  # (N, F0)

        # Hidden GCN layers; activations stay resident (no HBM round-trip).
        for li in range(n_layers):
            w_ref = layer_refs[2 * li]
            b_ref = layer_refs[2 * li + 1]
            acc = None
            for m in range(n_modes):                    # static unroll, MXU
                support = jnp.dot(x, w_ref[m],
                                  preferred_element_type=jnp.float32)
                contrib = jnp.dot(adj[m], support.astype(cdt),
                                  preferred_element_type=jnp.float32)
                acc = contrib if acc is None else acc + contrib
            h = acc + b_ref[...]            # 1/M mean already folded into W
            if relus[li]:
                h = jnp.maximum(h, 0.0)
            x = h.astype(cdt)

        # Fused heads: compute A[m] @ x once, reuse for the concatenated
        # (mean | log_std) weight.
        head = None
        for m in range(n_modes):
            ax = jnp.dot(adj[m], x, preferred_element_type=jnp.float32)
            contrib = jnp.dot(ax.astype(cdt), w_head_ref[m],
                              preferred_element_type=jnp.float32)
            head = contrib if head is None else head + contrib
        head = head + b_head_ref[...]                   # (N, 2*zp) f32

        z_mean = head[:, :zp]
        z_log_std = head[:, zp:]
        # Reparameterization fused into the epilogue (VPU + EUP), lane-dense
        # (N, zp) store; padded lanes are sliced off by the wrapper.
        o_ref[...] = (z_mean + eps_ref[...] * jnp.exp(z_log_std)
                      ).astype(o_ref.dtype)

    return kernel


def fused_vae_encode(x0, adjs, layer_ws, layer_bs, w_head, b_head, eps_pad,
                     *, relus, zp, compute_dtype):
    """Run the whole encode path in a single pallas_call."""
    n = x0.shape[0]
    n_modes = adjs.shape[0]
    n_layers = len(layer_ws)

    kernel = _make_fused_encode_kernel(n_layers, n_modes, tuple(relus), zp,
                                       compute_dtype)

    inputs = [x0.astype(compute_dtype), adjs.astype(compute_dtype)]
    for w, b in zip(layer_ws, layer_bs):
        inputs.append(w)
        inputs.append(b)
    inputs += [w_head, b_head, eps_pad]

    return pl.pallas_call(
        kernel,
        out_shape=jax.ShapeDtypeStruct((n, zp), jnp.float32),
        in_specs=[_full_block(v.shape) for v in inputs],
        out_specs=_full_block((n, zp)),
    )(*inputs)


# --------------------------------------------------------------------------
# Model wrapper
# --------------------------------------------------------------------------
class MultiGCNModelVAEPallas:
    """Deterministically-initialized Pallas port of MultiGCNModelVAE.encode."""

    def __init__(self, modes, num_features, encode_features, gcn_hiddens,
                 gcn_relus, z_dim, seed=0, compute_dtype=jnp.bfloat16):
        self.modes = modes
        self.num_features = num_features
        self.encode_features = encode_features
        self.z_dim = z_dim
        self.gcn_relus = list(gcn_relus)
        self.compute_dtype = compute_dtype

        key = jax.random.PRNGKey(seed)
        self.layers = []          # list of (W(M,Fin,Fout) f32, b(Fout,) f32)
        prev = num_features
        for hidden in gcn_hiddens:
            key, kw = jax.random.split(key)
            scale = (6.0 / (prev + hidden)) ** 0.5
            w = jax.random.uniform(kw, (modes, prev, hidden),
                                   jnp.float32, -scale, scale)
            b = jnp.zeros((hidden,), jnp.float32)
            self.layers.append((w, b))
            prev = hidden

        def head(k):
            scale = (6.0 / (prev + z_dim)) ** 0.5
            w = jax.random.uniform(k, (modes, prev, z_dim),
                                   jnp.float32, -scale, scale)
            return w, jnp.zeros((z_dim,), jnp.float32)

        key, k1, k2 = jax.random.split(key, 3)
        self.w_mean, self.b_mean = head(k1)
        self.w_logstd, self.b_logstd = head(k2)

        # ------- kernel-ready parameters (prepared once on the host) -------
        # mean-over-modes folded into the (bf16) weights; biases stay f32.
        self._w_layers_k = [(w / modes).astype(compute_dtype)
                            for w, _ in self.layers]
        self._b_layers_k = [b.reshape(1, -1) for _, b in self.layers]

        # lane-dense padded width per head (>= 128, multiple of 128)
        self._zp = max(128, -(-z_dim // 128) * 128)
        zp = self._zp
        w_head = jnp.zeros((modes, prev, 2 * zp), jnp.float32)
        w_head = w_head.at[:, :, :z_dim].set(self.w_mean)
        w_head = w_head.at[:, :, zp:zp + z_dim].set(self.w_logstd)
        self._w_head_k = (w_head / modes).astype(compute_dtype)
        b_head = jnp.zeros((1, 2 * zp), jnp.float32)
        b_head = b_head.at[0, :z_dim].set(self.b_mean)
        b_head = b_head.at[0, zp:zp + z_dim].set(self.b_logstd)
        self._b_head_k = b_head

    def _input_features(self, features):
        if self.encode_features:
            return features
        n = features.shape[0]
        return jnp.concatenate(
            [jnp.eye(n, dtype=jnp.float32),
             jnp.zeros((n, self.num_features - n), jnp.float32)], axis=1)

    def encode(self, features, adjs, noise_key):
        x0 = self._input_features(features)
        n = x0.shape[0]
        eps = jax.random.normal(noise_key, (n, self.z_dim), jnp.float32)
        eps_pad = jnp.zeros((n, self._zp),
                            jnp.float32).at[:, :self.z_dim].set(eps)
        z_pad = fused_vae_encode(
            x0, adjs, self._w_layers_k, self._b_layers_k,
            self._w_head_k, self._b_head_k, eps_pad,
            relus=self.gcn_relus, zp=self._zp,
            compute_dtype=self.compute_dtype)
        return z_pad[:, :self.z_dim]

    # decode() raises NotImplementedError in the reference module.
    # TODO(synk): decode has no defined semantics to translate.


# --------------------------------------------------------------------------
# Pure-JAX reference mirroring the kernel math (same bf16 casts / order)
# --------------------------------------------------------------------------
def reference_encode(model, features, adjs, eps):
    cdt = model.compute_dtype
    x = model._input_features(features).astype(cdt)
    a = adjs.astype(cdt)
    for (w, b), relu in zip(model.layers, model.gcn_relus):
        wc = (w / model.modes).astype(cdt)
        acc = None
        for m in range(model.modes):
            s = jnp.dot(x, wc[m], preferred_element_type=jnp.float32)
            c = jnp.dot(a[m], s.astype(cdt), preferred_element_type=jnp.float32)
            acc = c if acc is None else acc + c
        h = acc + b
        if relu:
            h = jnp.maximum(h, 0.0)
        x = h.astype(cdt)
    wm = (model.w_mean / model.modes).astype(cdt)
    ws = (model.w_logstd / model.modes).astype(cdt)
    zm = None
    zs = None
    for m in range(model.modes):
        ax = jnp.dot(a[m], x, preferred_element_type=jnp.float32).astype(cdt)
        cm = jnp.dot(ax, wm[m], preferred_element_type=jnp.float32)
        cs = jnp.dot(ax, ws[m], preferred_element_type=jnp.float32)
        zm = cm if zm is None else zm + cm
        zs = cs if zs is None else zs + cs
    zm = zm + model.b_mean
    zs = zs + model.b_logstd
    return zm + eps * jnp.exp(zs)


# --------------------------------------------------------------------------
# Main
# --------------------------------------------------------------------------
if __name__ == "__main__":
    MODES = 2
    N_NODES = 16
    NUM_FEATURES = 16
    GCN_HIDDENS = [32, 32]
    GCN_RELUS = [True, True]
    Z_DIM = 8

    root = jax.random.PRNGKey(0)
    k_feat, k_adj, k_noise = jax.random.split(root, 3)

    features = jax.random.normal(k_feat, (N_NODES, NUM_FEATURES), jnp.float32)
    # symmetric-ish normalized adjacency stack (modes, N, N)
    raw = jax.random.uniform(k_adj, (MODES, N_NODES, N_NODES), jnp.float32)
    adjs = (raw + jnp.swapaxes(raw, 1, 2)) * 0.5
    adjs = adjs / jnp.sum(adjs, axis=-1, keepdims=True)

    model = MultiGCNModelVAEPallas(
        modes=MODES, num_features=NUM_FEATURES, encode_features=True,
        gcn_hiddens=GCN_HIDDENS, gcn_relus=GCN_RELUS, z_dim=Z_DIM, seed=0)

    z = model.encode(features, adjs, k_noise)
    z = jax.block_until_ready(z)
    assert z.shape == (N_NODES, Z_DIM)

    # correctness check vs a pure-JAX reference of the same (bf16-cast) math
    eps = jax.random.normal(k_noise, (N_NODES, Z_DIM), jnp.float32)
    z_ref = reference_encode(model, features, adjs, eps)
    assert jnp.allclose(z, z_ref, atol=1e-2, rtol=1e-2), "mismatch vs reference"

    print("KERNEL_OK")
</pallas_src>

<mosaic_0001>
module attributes {stable_mosaic.version = 11 : i64} {
  func.func @kernel(%arg0: memref<16x16xbf16, #tpu.memory_space<vmem>>, %arg1: memref<2x16x16xbf16, #tpu.memory_space<vmem>>, %arg2: memref<2x16x32xbf16, #tpu.memory_space<vmem>>, %arg3: memref<1x32xf32, #tpu.memory_space<vmem>>, %arg4: memref<2x32x32xbf16, #tpu.memory_space<vmem>>, %arg5: memref<1x32xf32, #tpu.memory_space<vmem>>, %arg6: memref<2x32x256xbf16, #tpu.memory_space<vmem>>, %arg7: memref<1x256xf32, #tpu.memory_space<vmem>>, %arg8: memref<16x128xf32, #tpu.memory_space<vmem>>, %arg9: memref<16x128xf32, #tpu.memory_space<vmem>>) attributes {dimension_semantics = [], scalar_prefetch = 0 : i64, scratch_operands = 0 : i64, tpu.core_type = #tpu.core_type<tc>} {
    %c0 = arith.constant 0 : index
    %c0_0 = arith.constant 0 : index
    %c0_1 = arith.constant 0 : index
    %0 = vector.load %arg1[%c0, %c0_0, %c0_1] : memref<2x16x16xbf16, #tpu.memory_space<vmem>>, vector<1x16x16xbf16>
    %1 = vector.shape_cast %0 : vector<1x16x16xbf16> to vector<16x16xbf16>
    %c1 = arith.constant 1 : index
    %c0_2 = arith.constant 0 : index
    %c0_3 = arith.constant 0 : index
    %2 = vector.load %arg1[%c1, %c0_2, %c0_3] : memref<2x16x16xbf16, #tpu.memory_space<vmem>>, vector<1x16x16xbf16>
    %3 = vector.shape_cast %2 : vector<1x16x16xbf16> to vector<16x16xbf16>
    %c0_4 = arith.constant 0 : index
    %c0_5 = arith.constant 0 : index
    %4 = vector.load %arg0[%c0_4, %c0_5] : memref<16x16xbf16, #tpu.memory_space<vmem>>, vector<16x16xbf16>
    %c0_6 = arith.constant 0 : index
    %c0_7 = arith.constant 0 : index
    %c0_8 = arith.constant 0 : index
    %5 = vector.load %arg2[%c0_6, %c0_7, %c0_8] : memref<2x16x32xbf16, #tpu.memory_space<vmem>>, vector<1x16x32xbf16>
    %6 = vector.shape_cast %5 : vector<1x16x32xbf16> to vector<16x32xbf16>
    %cst = arith.constant dense<0.000000e+00> : vector<16x32xf32>
    %7 = tpu.matmul %4, %6, %cst {dimension_numbers = #tpu.dot_dimension_numbers<[1], [0], [0], [1], [0, 0, 1, 1], [], []>} : vector<16x16xbf16>, vector<16x32xbf16>, vector<16x32xf32> -> vector<16x32xf32>
    %8 = arith.truncf %7 : vector<16x32xf32> to vector<16x32xbf16>
    %cst_9 = arith.constant dense<0.000000e+00> : vector<16x32xf32>
    %9 = tpu.matmul %1, %8, %cst_9 {dimension_numbers = #tpu.dot_dimension_numbers<[1], [0], [0], [1], [0, 0, 1, 1], [], []>} : vector<16x16xbf16>, vector<16x32xbf16>, vector<16x32xf32> -> vector<16x32xf32>
    %c1_10 = arith.constant 1 : index
    %c0_11 = arith.constant 0 : index
    %c0_12 = arith.constant 0 : index
    %10 = vector.load %arg2[%c1_10, %c0_11, %c0_12] : memref<2x16x32xbf16, #tpu.memory_space<vmem>>, vector<1x16x32xbf16>
    %11 = vector.shape_cast %10 : vector<1x16x32xbf16> to vector<16x32xbf16>
    %cst_13 = arith.constant dense<0.000000e+00> : vector<16x32xf32>
    %12 = tpu.matmul %4, %11, %cst_13 {dimension_numbers = #tpu.dot_dimension_numbers<[1], [0], [0], [1], [0, 0, 1, 1], [], []>} : vector<16x16xbf16>, vector<16x32xbf16>, vector<16x32xf32> -> vector<16x32xf32>
    %13 = arith.truncf %12 : vector<16x32xf32> to vector<16x32xbf16>
    %cst_14 = arith.constant dense<0.000000e+00> : vector<16x32xf32>
    %14 = tpu.matmul %3, %13, %cst_14 {dimension_numbers = #tpu.dot_dimension_numbers<[1], [0], [0], [1], [0, 0, 1, 1], [], []>} : vector<16x16xbf16>, vector<16x32xbf16>, vector<16x32xf32> -> vector<16x32xf32>
    %15 = arith.addf %9, %14 : vector<16x32xf32>
    %c0_15 = arith.constant 0 : index
    %c0_16 = arith.constant 0 : index
    %16 = vector.load %arg3[%c0_15, %c0_16] : memref<1x32xf32, #tpu.memory_space<vmem>>, vector<1x32xf32>
    %17 = vector.broadcast %16 : vector<1x32xf32> to vector<16x32xf32>
    %18 = arith.addf %15, %17 : vector<16x32xf32>
    %cst_17 = arith.constant 0.000000e+00 : f32
    %19 = vector.broadcast %cst_17 : f32 to vector<16x32xf32>
    %20 = arith.maximumf %18, %19 : vector<16x32xf32>
    %21 = arith.truncf %20 : vector<16x32xf32> to vector<16x32xbf16>
    %c0_18 = arith.constant 0 : index
    %c0_19 = arith.constant 0 : index
    %c0_20 = arith.constant 0 : index
    %22 = vector.load %arg4[%c0_18, %c0_19, %c0_20] : memref<2x32x32xbf16, #tpu.memory_space<vmem>>, vector<1x32x32xbf16>
    %23 = vector.shape_cast %22 : vector<1x32x32xbf16> to vector<32x32xbf16>
    %cst_21 = arith.constant dense<0.000000e+00> : vector<16x32xf32>
    %24 = tpu.matmul %21, %23, %cst_21 {dimension_numbers = #tpu.dot_dimension_numbers<[1], [0], [0], [1], [0, 0, 1, 1], [], []>} : vector<16x32xbf16>, vector<32x32xbf16>, vector<16x32xf32> -> vector<16x32xf32>
    %25 = arith.truncf %24 : vector<16x32xf32> to vector<16x32xbf16>
    %cst_22 = arith.constant dense<0.000000e+00> : vector<16x32xf32>
    %26 = tpu.matmul %1, %25, %cst_22 {dimension_numbers = #tpu.dot_dimension_numbers<[1], [0], [0], [1], [0, 0, 1, 1], [], []>} : vector<16x16xbf16>, vector<16x32xbf16>, vector<16x32xf32> -> vector<16x32xf32>
    %c1_23 = arith.constant 1 : index
    %c0_24 = arith.constant 0 : index
    %c0_25 = arith.constant 0 : index
    %27 = vector.load %arg4[%c1_23, %c0_24, %c0_25] : memref<2x32x32xbf16, #tpu.memory_space<vmem>>, vector<1x32x32xbf16>
    %28 = vector.shape_cast %27 : vector<1x32x32xbf16> to vector<32x32xbf16>
    %cst_26 = arith.constant dense<0.000000e+00> : vector<16x32xf32>
    %29 = tpu.matmul %21, %28, %cst_26 {dimension_numbers = #tpu.dot_dimension_numbers<[1], [0], [0], [1], [0, 0, 1, 1], [], []>} : vector<16x32xbf16>, vector<32x32xbf16>, vector<16x32xf32> -> vector<16x32xf32>
    %30 = arith.truncf %29 : vector<16x32xf32> to vector<16x32xbf16>
    %cst_27 = arith.constant dense<0.000000e+00> : vector<16x32xf32>
    %31 = tpu.matmul %3, %30, %cst_27 {dimension_numbers = #tpu.dot_dimension_numbers<[1], [0], [0], [1], [0, 0, 1, 1], [], []>} : vector<16x16xbf16>, vector<16x32xbf16>, vector<16x32xf32> -> vector<16x32xf32>
    %32 = arith.addf %26, %31 : vector<16x32xf32>
    %c0_28 = arith.constant 0 : index
    %c0_29 = arith.constant 0 : index
    %33 = vector.load %arg5[%c0_28, %c0_29] : memref<1x32xf32, #tpu.memory_space<vmem>>, vector<1x32xf32>
    %34 = vector.broadcast %33 : vector<1x32xf32> to vector<16x32xf32>
    %35 = arith.addf %32, %34 : vector<16x32xf32>
    %cst_30 = arith.constant 0.000000e+00 : f32
    %36 = vector.broadcast %cst_30 : f32 to vector<16x32xf32>
    %37 = arith.maximumf %35, %36 : vector<16x32xf32>
    %38 = arith.truncf %37 : vector<16x32xf32> to vector<16x32xbf16>
    %cst_31 = arith.constant dense<0.000000e+00> : vector<16x32xf32>
    %39 = tpu.matmul %1, %38, %cst_31 {dimension_numbers = #tpu.dot_dimension_numbers<[1], [0], [0], [1], [0, 0, 1, 1], [], []>} : vector<16x16xbf16>, vector<16x32xbf16>, vector<16x32xf32> -> vector<16x32xf32>
    %40 = arith.truncf %39 : vector<16x32xf32> to vector<16x32xbf16>
    %c0_32 = arith.constant 0 : index
    %c0_33 = arith.constant 0 : index
    %c0_34 = arith.constant 0 : index
    %41 = vector.load %arg6[%c0_32, %c0_33, %c0_34] : memref<2x32x256xbf16, #tpu.memory_space<vmem>>, vector<1x32x256xbf16>
    %42 = vector.shape_cast %41 : vector<1x32x256xbf16> to vector<32x256xbf16>
    %cst_35 = arith.constant dense<0.000000e+00> : vector<16x256xf32>
    %43 = tpu.matmul %40, %42, %cst_35 {dimension_numbers = #tpu.dot_dimension_numbers<[1], [0], [0], [1], [0, 0, 1, 1], [], []>} : vector<16x32xbf16>, vector<32x256xbf16>, vector<16x256xf32> -> vector<16x256xf32>
    %cst_36 = arith.constant dense<0.000000e+00> : vector<16x32xf32>
    %44 = tpu.matmul %3, %38, %cst_36 {dimension_numbers = #tpu.dot_dimension_numbers<[1], [0], [0], [1], [0, 0, 1, 1], [], []>} : vector<16x16xbf16>, vector<16x32xbf16>, vector<16x32xf32> -> vector<16x32xf32>
    %45 = arith.truncf %44 : vector<16x32xf32> to vector<16x32xbf16>
    %c1_37 = arith.constant 1 : index
    %c0_38 = arith.constant 0 : index
    %c0_39 = arith.constant 0 : index
    %46 = vector.load %arg6[%c1_37, %c0_38, %c0_39] : memref<2x32x256xbf16, #tpu.memory_space<vmem>>, vector<1x32x256xbf16>
    %47 = vector.shape_cast %46 : vector<1x32x256xbf16> to vector<32x256xbf16>
    %cst_40 = arith.constant dense<0.000000e+00> : vector<16x256xf32>
    %48 = tpu.matmul %45, %47, %cst_40 {dimension_numbers = #tpu.dot_dimension_numbers<[1], [0], [0], [1], [0, 0, 1, 1], [], []>} : vector<16x32xbf16>, vector<32x256xbf16>, vector<16x256xf32> -> vector<16x256xf32>
    %49 = arith.addf %43, %48 : vector<16x256xf32>
    %c0_41 = arith.constant 0 : index
    %c0_42 = arith.constant 0 : index
    %50 = vector.load %arg7[%c0_41, %c0_42] : memref<1x256xf32, #tpu.memory_space<vmem>>, vector<1x256xf32>
    %51 = vector.broadcast %50 : vector<1x256xf32> to vector<16x256xf32>
    %52 = arith.addf %49, %51 : vector<16x256xf32>
    %53 = vector.extract_strided_slice %52 {offsets = [0, 0], sizes = [16, 128], strides = [1, 1]} : vector<16x256xf32> to vector<16x128xf32>
    %54 = vector.extract_strided_slice %52 {offsets = [0, 128], sizes = [16, 128], strides = [1, 1]} : vector<16x256xf32> to vector<16x128xf32>
    %c0_43 = arith.constant 0 : index
    %c0_44 = arith.constant 0 : index
    %55 = vector.load %arg8[%c0_43, %c0_44] : memref<16x128xf32, #tpu.memory_space<vmem>>, vector<16x128xf32>
    %56 = math.exp %54 : vector<16x128xf32>
    %57 = arith.mulf %55, %56 : vector<16x128xf32>
    %58 = arith.addf %53, %57 : vector<16x128xf32>
    %c0_45 = arith.constant 0 : index
    %c0_46 = arith.constant 0 : index
    %59 = vector.load %arg9[%c0_45, %c0_46] : memref<16x128xf32, #tpu.memory_space<vmem>>, vector<16x128xf32>
    tpu.vector_store %arg9[%c0_45, %c0_46], %58 {strides = array<i32>} : memref<16x128xf32, #tpu.memory_space<vmem>>, vector<16x128xf32>,
    return
  }
}

</mosaic_0001>

<bundles_post_ra>
// kernel: tpu_custom_call.1
= control target key start
LH: loop header
LB: loop body
LE: loop exit
PB: predicated region body
PF: predicated region fallthrough
CT: control target
= control target key end

     0   :  { %14 = vsyncpa [#allocation3], 0  ;;  %s941_s0 = inlined_call_operand.hbm [shape: bf16[16,16], index: 0, kind: input, shape index: {}]   ;;  %s942_s1 = inlined_call_operand.hbm [shape: bf16[2,16,16], index: 1, kind: input, shape index: {}]   ;;  %s943_s2 = inlined_call_operand.hbm [shape: bf16[2,16,32], index: 2, kind: input, shape index: {}]   ;;  %s944_s3 = inlined_call_operand.vmem [shape: f32[1,32], index: 3, kind: input, shape index: {}]   ;;  %s945_s4 = inlined_call_operand.hbm [shape: bf16[2,32,32], index: 4, kind: input, shape index: {}]   ;;  %s946_s5 = inlined_call_operand.vmem [shape: f32[1,32], index: 5, kind: input, shape index: {}]   ;;  %s947_s6 = inlined_call_operand.hbm [shape: bf16[2,32,256], index: 6, kind: input, shape index: {}]   ;;  %s948_s7 = inlined_call_operand.vmem [shape: f32[1,256], index: 7, kind: input, shape index: {}]   ;;  %s949_s8 = inlined_call_operand.hbm [shape: f32[16,128], index: 8, kind: input, shape index: {}]   ;;  %s950_s9 = inlined_call_operand.hbm [shape: f32[16,128], index: 9, kind: output, shape index: {}]  }
   0x1   :  { %15 = vsyncpa [#allocation6], 0 }
   0x2   :  { %16 = vsyncpa [#allocation9], 0 }
   0x3   :  { %17 = vsyncpa [#allocation12], 0 }
   0x4   :  { %18 = vsyncpa [#allocation4], 0  ;;  %s36_s11 = sshll.u32 %s942_s1, 4  ;;  %s827_s12 = smov [#allocation5]   ;;  %s37_s11 = int_to_ptr.hbm [resolvable:$true] %s36_s11 }
   0x5   :  { %s38_s13 = sshll.u32 %s827_s12, 4  ;;  %s64_s16 = sshll.u32 %s945_s4, 4  ;;  %s39_s13 = int_to_ptr.vmem [resolvable:$true] %s38_s13  ;;  %s65_s16 = int_to_ptr.hbm [resolvable:$true] %s64_s16 }
   0x6   :  { %s828_s17 = smov 64   ;;  %s829_s18 = smov 4  }
   0x7   :  { %44 = dma.hbm_to_vmem [thread:$0]  %s37_s11, 256, %s39_s13, [#allocation6], %s828_s17, %s828_s17, %s829_s18  }
   0x8   :  { %s830_s19 = smov [#allocation8]   ;;  %s23_s23 = sshll.u32 %s941_s0, 4  ;;  %s24_s23 = int_to_ptr.hbm [resolvable:$true] %s23_s23 }
   0x9   :  { %s66_s20 = sshll.u32 %s830_s19, 4  ;;  %s49_s25 = sshll.u32 %s943_s2, 4  ;;  %s67_s20 = int_to_ptr.vmem [resolvable:$true] %s66_s20  ;;  %s50_s25 = int_to_ptr.hbm [resolvable:$true] %s49_s25 }
   0xa   :  { %72 = dma.hbm_to_vmem [thread:$0]  %s65_s16, 512, %s67_s20, [#allocation9], %s828_s17, %s828_s17, %s829_s18  }
   0xb   :  { %s831_s26 = smov [#allocation2]   ;;  %s832_s4 = smov [#allocation7]  }
   0xc   :  { %s25_s27 = sshll.u32 %s831_s26, 4  ;;  %s51_s28 = sshll.u32 %s832_s4, 4  ;;  %s26_s27 = int_to_ptr.vmem [resolvable:$true] %s25_s27  ;;  %s52_s28 = int_to_ptr.vmem [resolvable:$true] %s51_s28 }
   0xd   :  { %31 = dma.hbm_to_vmem [thread:$0]  %s24_s23, 128, %s26_s27, [#allocation3], %s828_s17, %s828_s17, %s829_s18  }
   0xe   :  { %s79_s10 = sshll.u32 %s947_s6, 4  ;;  %s833_s0 = smov [#allocation10]   ;;  %s80_s10 = int_to_ptr.hbm [resolvable:$true] %s79_s10 }
   0xf   :  { %57 = dma.hbm_to_vmem [thread:$0]  %s50_s25, 256, %s52_s28, [#allocation6], %s828_s17, %s828_s17, %s829_s18  }
  0x10   :  { %s81_s11 = sshll.u32 %s833_s0, 4  ;;  %s94_s2 = sshll.u32 %s949_s8, 4  ;;  %s82_s11 = int_to_ptr.vmem [resolvable:$true] %s81_s11  ;;  %s95_s2 = int_to_ptr.hbm [resolvable:$true] %s94_s2 }
  0x11   :  { %s834_s14 = smov 128   ;;  %s835_s15 = smov 8  }
  0x12   :  { %87 = dma.hbm_to_vmem [thread:$0]  %s80_s10, 1024, %s82_s11, [#allocation9], %s834_s14, %s834_s14, %s835_s15  }
  0x13   :  { %s836_s16 = smov [#allocation11]  }
  0x14   :  { %s96_s19 = sshll.u32 %s836_s16, 4  ;;  %s97_s19 = int_to_ptr.vmem [resolvable:$true] %s96_s19 }
  0x15   :  { %102 = dma.hbm_to_vmem [thread:$0]  %s95_s2, 256, %s97_s19, [#allocation12], %s834_s14, %s834_s14, %s835_s15  }
  0x16   :  { %817 = dma.done.wait [#allocation3], 128  }
  0x17   :  { %818 = vsyncadd [#allocation3], 4294967168 }
  0x18   :  { %819 = dma.done.wait [#allocation6], 512  }
  0x19   :  { %820 = vsyncadd [#allocation6], 4294966784 }
  0x1a   :  { %821 = dma.done.wait [#allocation9], 1536  }
  0x1b   :  { %822 = vsyncadd [#allocation9], 4294965760 }
  0x1c   :  { %823 = dma.done.wait [#allocation12], 256  }
  0x1d   :  { %824 = vsyncadd [#allocation12], 4294967040  ;;  %v618_v0 = vld [vmem:[#allocation7] sm:$0xff]  ;;  %v619_v1 = vld [vmem:[#allocation7 + $0x8] sm:$0xff]  ;;  %vm148_vm0 = vcmask 130048   ;;  %vm260_vm1 = vcmask 261120  }
  0x1e   :  { %v617_v2 = vld [vmem:[#allocation2] sm:$0xff]  ;;  %159 = vmatpush.bf16.msra.mxu0 %v618_v0  ;;  %183 = vmatpush.bf16.msra.mxu1 %v619_v1  ;;  %v616_v9 = vld [vmem:[#allocation5 + $0x8] sm:$0xff]  ;;  %v615_v10 = vld [vmem:[#allocation5] sm:$0xff]  ;;  %s517_s23 = sshll.u32 %s950_s9, 4  ;;  %s518_s23 = int_to_ptr.hbm [resolvable:$true] %s517_s23 }
  0x1f   :  { %v621_v11 = vld [vmem:[#allocation8 + $0x8] sm:$0xff]  ;;  %v623_v12 = vld [vmem:[#allocation8 + $0x18] sm:$0xff]  ;;  %v620_v13 = vld [vmem:[#allocation8] sm:$0xff] }
  0x20   :  { %v622_v14 = vld [vmem:[#allocation8 + $0x10] sm:$0xff]  ;;  %v643_v18 = vld [vmem:[%s944_s3] ss:$0 sm:$0xff]  ;;  %v591_v49 = vld [vmem:[#allocation10 + $0x38] sm:$0xf0] }
  0x21   :  { %541 = vmatmul.msk.bf16.vlgmr.msra.gmra.mxu0 %vm148_vm0, %v617_v2  ;;  %546 = vmatmul.msk.bf16.vlgmr.msra.gmra.mxu1 %vm148_vm0, %v617_v2  ;;  %v644_v36 = vld [vmem:[%s946_s5] ss:$0 sm:$0xff]  ;;  %v589_v45 = vld [vmem:[#allocation10 + $0x30] sm:$0xf]  ;;  %v630_v47 = vld [vmem:[#allocation10 + $0x34] sm:$0xf] }
  0x22   :  { %270 = vmatpush.bf16.msrb.mxu0 %v621_v11  ;;  %302 = vmatpush.bf16.msrb.mxu1 %v623_v12  ;;  %v631_v46 = vld [vmem:[#allocation10 + $0x34] sm:$0xf0]  ;;  %v607_v50 = vld [vmem:[#allocation10 + $0x10] sm:$0xf]  ;;  %v594_v52 = vor.u32 %v630_v47, %v591_v49  ;;  %v626_v54 = vld [vmem:[#allocation10 + $0x14] sm:$0xf] }
  0x23   :  { %v590_v48 = vor.u32 %v631_v46, %v589_v45  ;;  %v627_v51 = vld [vmem:[#allocation10 + $0x14] sm:$0xf0]  ;;  %v609_v55 = vld [vmem:[#allocation10 + $0x18] sm:$0xf0]  ;;  %v581_v57 = vld [vmem:[#allocation10 + $0x20] sm:$0xf] }
  0x24   :  { %v608_v53 = vor.u32 %v627_v51, %v607_v50  ;;  %v612_v56 = vor.u32 %v626_v54, %v609_v55  ;;  %v629_v58 = vld [vmem:[#allocation10 + $0x24] sm:$0xf0]  ;;  %v628_v59 = vld [vmem:[#allocation10 + $0x24] sm:$0xf]  ;;  %v583_v61 = vld [vmem:[#allocation10 + $0x28] sm:$0xf0] }
  0x25   :  { %v582_v60 = vor.u32 %v629_v58, %v581_v57  ;;  %v599_v62 = vld [vmem:[#allocation10] sm:$0xf]  ;;  %v625_v63 = vld [vmem:[#allocation10 + $0x4] sm:$0xf0]  ;;  %v586_v0 = vor.u32 %v628_v59, %v583_v61  ;;  %v624_v2 = vld [vmem:[#allocation10 + $0x4] sm:$0xf] }
  0x26   :  { %271 = vmatpush.bf16.msrb.mxu0 %v620_v13  ;;  %303 = vmatpush.bf16.msrb.mxu1 %v622_v14  ;;  %v600_v1 = vor.u32 %v625_v63, %v599_v62  ;;  %v489_v11 = vld [vmem:[%s948_s7] sm:$0x3]  ;;  %s837_s7 = smov [#allocation13]  }
  0x27   :  { %v492_v13 = vperm.slane %v489_v11, 1  ;;  %s515_s20 = sshll.u32 %s837_s7, 4  ;;  %s516_s20 = int_to_ptr.vmem [resolvable:$true] %s515_s20 }
  0x9e   :  { %v161_v3 = vpop.f32.mrf.mxu0  ;;  %v185_v4 = vpop.f32.mrf.mxu1 }
  0xa6   :  { %v163_v5 = vpop.f32.mrf.mxu0  ;;  %v187_v6 = vpop.f32.mrf.mxu1 }
  0xa7   :  { %v190_v7 = vpack.c.bf16 %v187_v6, %v185_v4  ;;  %v166_v8 = vpack.c.bf16 %v163_v5, %v161_v3  ;;  %v601_v3 = vld [vmem:[#allocation10 + $0x8] sm:$0xf0] }
  0xa8   :  { %v604_v4 = vor.u32 %v624_v2, %v601_v3 }
  0xa9   :  { %206 = vmatpush.bf16.msra.mxu2 %v190_v7  ;;  %228 = vmatpush.bf16.msra.mxu3 %v166_v8 }
  0xac   :  { %551 = vmatmul.msk.bf16.vlgmr.msra.gmra.mxu2 %vm148_vm0, %v616_v9  ;;  %556 = vmatmul.msk.bf16.vlgmr.msra.gmra.mxu3 %vm148_vm0, %v615_v10 }
 0x12f   :  { %v208_v15 = vpop.f32.mrf.mxu2  ;;  %v230_v16 = vpop.f32.mrf.mxu3 }
 0x130   :  { %v231_v17 = vadd.f32 %v230_v16, %v208_v15 }
 0x132   :  { %v239_v21 = vadd.f32 %v643_v18, %v231_v17 }
 0x134   :  { %v241_v24 = vmax.f32 %v239_v21, 0.0 }
 0x137   :  { %v210_v19 = vpop.f32.mrf.mxu2  ;;  %v232_v20 = vpop.f32.mrf.mxu3 }
 0x138   :  { %v233_v22 = vadd.f32 %v232_v20, %v210_v19 }
 0x13a   :  { %v240_v23 = vadd.f32 %v643_v18, %v233_v22 }
 0x13c   :  { %v242_v25 = vmax.f32 %v240_v23, 0.0 }
 0x13e   :  { %v243_v26 = vpack.c.bf16 %v242_v25, %v241_v24  ;;  %v491_v24 = vperm.slane %v489_v11, 0 }
 0x140   :  { %565 = vmatmul.msk.bf16.vlgmr.msrb.gmra.mxu0 %vm260_vm1, %v243_v26  ;;  %574 = vmatmul.msk.bf16.vlgmr.msrb.gmra.mxu1 %vm260_vm1, %v243_v26  ;;  %v499_v26 = vld [vmem:[#allocation11] sm:$0xff] }
 0x1bd   :  { %v273_v27 = vpop.f32.mrf.mxu0  ;;  %v305_v28 = vpop.f32.mrf.mxu1 }
 0x1c5   :  { %v275_v29 = vpop.f32.mrf.mxu0  ;;  %v307_v30 = vpop.f32.mrf.mxu1 }
 0x1c6   :  { %v278_v31 = vpack.c.bf16 %v275_v29, %v273_v27  ;;  %v310_v32 = vpack.c.bf16 %v307_v30, %v305_v28 }
 0x1c8   :  { %318 = vmatpush.bf16.msrb.mxu2 %v310_v32  ;;  %332 = vmatpush.bf16.msrb.mxu3 %v278_v31 }
 0x1cb   :  { %575 = vmatmul.msk.bf16.vlgmr.msrb.gmra.mxu2 %vm148_vm0, %v616_v9  ;;  %576 = vmatmul.msk.bf16.vlgmr.msrb.gmra.mxu3 %vm148_vm0, %v615_v10 }
 0x1cc   :  { %416 = vmatpush.bf16.msra.mxu2 %v590_v48  ;;  %430 = vmatpush.bf16.msra.mxu3 %v594_v52 }
 0x1d0   :  { %417 = vmatpush.bf16.msra.mxu2 %v582_v60  ;;  %431 = vmatpush.bf16.msra.mxu3 %v586_v0 }
 0x24e   :  { %v320_v33 = vpop.f32.mrf.mxu2  ;;  %v334_v34 = vpop.f32.mrf.mxu3 }
 0x24f   :  { %v335_v35 = vadd.f32 %v334_v34, %v320_v33 }
 0x251   :  { %v343_v39 = vadd.f32 %v644_v36, %v335_v35  ;;  %v500_v35 = vld [vmem:[#allocation11 + $0x8] sm:$0xff] }
 0x253   :  { %v345_v42 = vmax.f32 %v343_v39, 0.0 }
 0x256   :  { %v322_v37 = vpop.f32.mrf.mxu2  ;;  %v336_v38 = vpop.f32.mrf.mxu3 }
 0x257   :  { %v337_v40 = vadd.f32 %v336_v38, %v322_v37 }
 0x259   :  { %v344_v41 = vadd.f32 %v644_v36, %v337_v40 }
 0x25b   :  { %v346_v43 = vmax.f32 %v344_v41, 0.0 }
 0x25d   :  { %v347_v44 = vpack.c.bf16 %v346_v43, %v345_v42 }
 0x25f   :  { %355 = vmatpush.bf16.msra.mxu0 %v347_v44  ;;  %374 = vmatpush.bf16.msra.mxu1 %v347_v44 }
 0x262   :  { %578 = vmatmul.msk.bf16.vlgmr.msra.gmra.mxu1 %vm148_vm0, %v616_v9  ;;  %577 = vmatmul.msk.bf16.vlgmr.msra.gmra.mxu0 %vm148_vm0, %v615_v10 }
 0x263   :  { %467 = vmatpush.bf16.msrb.mxu0 %v608_v53  ;;  %481 = vmatpush.bf16.msrb.mxu1 %v612_v56 }
 0x267   :  { %468 = vmatpush.bf16.msrb.mxu0 %v600_v1  ;;  %482 = vmatpush.bf16.msrb.mxu1 %v604_v4 }
 0x2df   :  { %v376_v5 = vpop.f32.mrf.mxu1  ;;  %v357_v6 = vpop.f32.mrf.mxu0 }
 0x2e7   :  { %v378_v7 = vpop.f32.mrf.mxu1  ;;  %v359_v8 = vpop.f32.mrf.mxu0 }
 0x2e8   :  { %v381_v9 = vpack.c.bf16 %v378_v7, %v376_v5  ;;  %v362_v10 = vpack.c.bf16 %v359_v8, %v357_v6 }
 0x2ea   :  { %595 = vmatmul.msk.bf16.vlgmr.msra.gmra.mxu2 %vm260_vm1, %v381_v9  ;;  %596 = vmatmul.msk.bf16.vlgmr.msra.gmra.mxu3 %vm260_vm1, %v381_v9 }
 0x2eb   :  { %613 = vmatmul.msk.bf16.vlgmr.msrb.gmra.mxu0 %vm260_vm1, %v362_v10  ;;  %614 = vmatmul.msk.bf16.vlgmr.msrb.gmra.mxu1 %vm260_vm1, %v362_v10 }
 0x368   :  { %v484_v12 = vpop.f32.mrf.mxu1  ;;  %v470_v19 = vpop.f32.mrf.mxu0 }
 0x36d   :  { %v433_v14 = vpop.f32.mrf.mxu3  ;;  %v419_v17 = vpop.f32.mrf.mxu2 }
 0x36e   :  { %v485_v15 = vadd.f32 %v484_v12, %v433_v14  ;;  %v471_v23 = vadd.f32 %v470_v19, %v419_v17 }
 0x370   :  { %v496_v16 = vadd.f32 %v492_v13, %v485_v15  ;;  %v486_v20 = vpop.f32.mrf.mxu1  ;;  %v495_v29 = vadd.f32 %v491_v24, %v471_v23  ;;  %v472_v33 = vpop.f32.mrf.mxu0 }
 0x372   :  { %v501_v18 = vmul.f32 1.442695, %v496_v16 }
 0x374   :  { %645 = vpow2.f32 %v501_v18 }
 0x375   :  { %v435_v21 = vpop.f32.mrf.mxu3  ;;  %v421_v31 = vpop.f32.mrf.mxu2 }
 0x376   :  { %v487_v22 = vadd.f32 %v486_v20, %v435_v21  ;;  %v473_v34 = vadd.f32 %v472_v33, %v421_v31 }
 0x378   :  { %v498_v25 = vadd.f32 %v492_v13, %v487_v22  ;;  %v497_v37 = vadd.f32 %v491_v24, %v473_v34 }
 0x37a   :  { %v646_v27 = vpop.eup %645  ;;  %v503_v28 = vmul.f32 1.442695, %v498_v25 }
 0x37b   :  { %v505_v30 = vmul.f32 %v646_v27, %v499_v26 }
 0x37c   :  { %647 = vpow2.f32 %v503_v28 }
 0x37d   :  { %v507_v32 = vadd.f32 %v505_v30, %v495_v29 }
 0x37f   :  { %509 = vst [vmem:[#allocation13] sm:$0xff] %v507_v32 }
 0x382   :  { %v648_v36 = vpop.eup %647 }
 0x383   :  { %v506_v38 = vmul.f32 %v648_v36, %v500_v35 }
 0x385   :  { %v508_v39 = vadd.f32 %v506_v38, %v497_v37 }
 0x387   :  { %510 = vst [vmem:[#allocation13 + $0x8] sm:$0xff] %v508_v39 }
 0x388   :  { %523 = dma.vmem_to_hbm [thread:$0]  %s516_s20, 256, %s518_s23, [#allocation4], %s834_s14, %s834_s14, %s835_s15  }
 0x389   :  { %825 = dma.done.wait [#allocation4], 256  }
 0x38a   :  { %826 = vsyncadd [#allocation4], 4294967040 }
 0x38b   :  { %528 = vsyncpa [#allocation3], 1 }
 0x38c   :  { %529 = vsyncpa [#allocation6], 1 }
 0x38d   :  { %530 = vsyncpa [#allocation9], 1 }
 0x38e   :  { %531 = vsyncpa [#allocation12], 1 }
 0x38f   :  { %532 = vsyncpa [#allocation4], 1 }

</bundles_post_ra>
